<compile_context>
chip_gen: v7x
topology: tpu7x:2x2x1
jax: 0.10.0
libtpu: 0.0.40
codegen_flags: <defaults>
</compile_context>

<pallas_src>
import functools

import jax
import jax.numpy as jnp
from jax.experimental import pallas as pl
from jax.experimental.pallas import tpu as pltpu


def _biaffine_kernel(*refs, o_dim, wi_pad, fuse_hw, has_bias):
    """One (batch, x-tile, y-tile) grid point.

    refs (has_bias=True):  h, w_flat, d_t, hb, db, out, hw_scratch
    refs (has_bias=False): h, w_flat, d_t, out, hw_scratch

    h_ref : (TX, I)            head reps (no ones column)
    w_ref : (I, O*I_pad)       o-fused flattened W_ii (VMEM-resident)
    dt_ref: (I_pad, TY)        dependent reps, pre-transposed in the wrapper
    hb_ref: (TX, O)            h @ w_col.T + w_b   (rank-1 bias, f32)
    db_ref: (O, TY)            d @ w_row.T         (rank-1 bias, f32)
    o_ref : (O, TX, TY)        direct PyTorch-layout output block
    hw_ref: (TX, O*I_pad) f32  scratch: h@W, computed once per x-tile (yt==0)
    """
    if has_bias:
        h_ref, w_ref, dt_ref, hb_ref, db_ref, o_ref, hw_ref = refs
    else:
        h_ref, w_ref, dt_ref, o_ref, hw_ref = refs

    yt = pl.program_id(2)

    @pl.when(yt == 0)
    def _():
        h = h_ref[...]
        if fuse_hw:
            # Small I_pad: one wide matmul keeps the MXU N dimension >= 256.
            hw_ref[...] = jnp.dot(h, w_ref[...], preferred_element_type=jnp.float32)
        else:
            # Large I_pad: per-o matmuls bound the live intermediate to TX x I_pad.
            for o in range(o_dim):
                hw_ref[:, o * wi_pad:(o + 1) * wi_pad] = jnp.dot(
                    h, w_ref[:, o * wi_pad:(o + 1) * wi_pad],
                    preferred_element_type=jnp.float32)

    dt = dt_ref[...]
    for o in range(o_dim):  # static unroll; O is small
        # 128-lane-aligned static slice (I_pad is a multiple of 128).
        hw_o = hw_ref[:, o * wi_pad:(o + 1) * wi_pad].astype(dt.dtype)
        res = jnp.dot(hw_o, dt, preferred_element_type=jnp.float32)   # (TX, TY)
        if has_bias:
            # Rank-1 bias terms: broadcast adds in f32 on the VPU.
            res = res + hb_ref[:, o:o + 1] + db_ref[o:o + 1, :]
        o_ref[o] = res.astype(o_ref.dtype)   # direct per-o store, no concat


def biaffine_forward(h, d, weight, bias: bool, *,
                     compute_dtype=jnp.float32,
                     tile_x: int = 256, tile_y: int = 512,
                     vmem_limit_bytes: int = 48 * 1024 * 1024):
    """h: (B, X, I), d: (B, Y, I), weight: (O, WI, WI), WI = I (+1 if bias)."""
    B, X, I = h.shape
    Bd, Y, Id = d.shape
    assert Bd == B and Id == I
    O = weight.shape[0]
    wi = I + 1 if bias else I
    assert weight.shape == (O, wi, wi)
    assert tile_x % 8 == 0 and tile_y % 128 == 0

    # ---- Rank-1 bias decomposition (no ones column, no WI misalignment). ----
    if bias:
        w_ii = weight[:, :I, :I]                                   # (O, I, I)
        w_col = weight[:, :I, I]                                   # (O, I)
        w_row = weight[:, I, :I]                                   # (O, I)
        w_b = weight[:, I, I]                                      # (O,)
        hb = jnp.einsum('bxi,oi->bxo', h, w_col) + w_b             # (B, X, O)
        db = jnp.einsum('byi,oi->boy', d, w_row)                   # (B, O, Y)
    else:
        w_ii = weight
        hb = db = None

    # Flatten O into the matmul N dimension; pad each o-slice's j axis to a
    # multiple of 128 lanes so in-kernel per-o slices are tile-aligned views.
    i_pad = pl.cdiv(I, 128) * 128
    w_flat = jnp.pad(w_ii, ((0, 0), (0, 0), (0, i_pad - I)))       # (O, I, I_pad)
    w_flat = jnp.transpose(w_flat, (1, 0, 2)).reshape(I, O * i_pad)
    w_flat = w_flat.astype(compute_dtype)

    # One-time wrapper transpose of d (amortized over all B*X/tx grid steps):
    # the second contraction becomes a plain NN matmul (no in-kernel XLU xpose).
    d_t = jnp.swapaxes(d, 1, 2)                                    # (B, I, Y)
    d_t = jnp.pad(d_t, ((0, 0), (0, i_pad - I), (0, 0))).astype(compute_dtype)
    h_c = h.astype(compute_dtype)

    # ---- Tiling: pad ragged X/Y to the tile size (keeps pipelining). ----
    tx = min(tile_x, X)
    ty = min(tile_y, Y)
    x_pad = pl.cdiv(X, tx) * tx
    y_pad = pl.cdiv(Y, ty) * ty
    if x_pad != X:
        h_c = jnp.pad(h_c, ((0, 0), (0, x_pad - X), (0, 0)))
        if bias:
            hb = jnp.pad(hb, ((0, 0), (0, x_pad - X), (0, 0)))
    if y_pad != Y:
        d_t = jnp.pad(d_t, ((0, 0), (0, 0), (0, y_pad - Y)))
        if bias:
            db = jnp.pad(db, ((0, 0), (0, 0), (0, y_pad - Y)))

    grid = (B, x_pad // tx, y_pad // ty)
    fuse_hw = i_pad < 256   # keep MXU N >= 256 only when per-o N is too narrow

    in_specs = [
        pl.BlockSpec((None, tx, I), lambda b, xt, yt: (b, xt, 0)),
        # Constant block index -> the flattened weight is DMA'd once and stays
        # VMEM-resident for the kernel's lifetime.
        pl.BlockSpec((I, O * i_pad), lambda b, xt, yt: (0, 0)),
        pl.BlockSpec((None, i_pad, ty), lambda b, xt, yt: (b, 0, yt)),
    ]
    inputs = [h_c, w_flat, d_t]
    if bias:
        hb = hb.astype(jnp.float32)   # epilogue adds stay f32 (v5e: no bf16 VPU)
        db = db.astype(jnp.float32)
        in_specs += [
            pl.BlockSpec((None, tx, O), lambda b, xt, yt: (b, xt, 0)),
            pl.BlockSpec((None, O, ty), lambda b, xt, yt: (b, 0, yt)),
        ]
        inputs += [hb, db]

    kernel = functools.partial(
        _biaffine_kernel, o_dim=O, wi_pad=i_pad, fuse_hw=fuse_hw, has_bias=bias)

    bytes_in = sum(int(a.size) * a.dtype.itemsize for a in inputs)
    cost = pl.CostEstimate(
        flops=2 * B * x_pad * I * O * i_pad + 2 * B * O * x_pad * i_pad * y_pad,
        transcendentals=0,
        bytes_accessed=bytes_in + B * O * x_pad * y_pad * 4,
    )

    out = pl.pallas_call(
        kernel,
        out_shape=jax.ShapeDtypeStruct((B, O, x_pad, y_pad), jnp.float32),
        grid_spec=pltpu.PrefetchScalarGridSpec(
            num_scalar_prefetch=0,
            grid=grid,
            in_specs=in_specs,
            # Output emitted directly in PyTorch (B, O, X, Y) layout; Y is the
            # lane dim (lane-dense / unmasked stores once Y is a 128-multiple).
            out_specs=pl.BlockSpec((None, O, tx, ty), lambda b, xt, yt: (b, 0, xt, yt)),
            # h@W cache, filled at yt==0 and reused across all Y tiles.
            scratch_shapes=[pltpu.VMEM((tx, O * i_pad), jnp.float32)],
        ),
        compiler_params=pltpu.CompilerParams(
            # B and X tiles are megacore-shardable; Y carries the hw scratch.
            dimension_semantics=("parallel", "parallel", "arbitrary"),
            vmem_limit_bytes=vmem_limit_bytes,
        ),
        cost_estimate=cost,
    )(*inputs)

    if x_pad != X or y_pad != Y:
        out = out[:, :, :X, :Y]
    return out


def init_biaffine_weight(key, input_dim: int, output_dim: int, bias: bool):
    """Deterministic xavier_uniform_ init matching nn.init.xavier_uniform_."""
    wi = input_dim + 1 if bias else input_dim
    fan_in = wi * wi
    fan_out = output_dim * wi
    bound = (6.0 / (fan_in + fan_out)) ** 0.5
    return jax.random.uniform(
        key, (output_dim, wi, wi), dtype=jnp.float32, minval=-bound, maxval=bound)


def _reference(h, d, weight, bias):
    if bias:
        h = jnp.concatenate([h, jnp.ones((*h.shape[:-1], 1), h.dtype)], axis=-1)
        d = jnp.concatenate([d, jnp.ones((*d.shape[:-1], 1), d.dtype)], axis=-1)
    return jnp.einsum('bxi,oij,byj->boxy', h, weight, d)


if __name__ == "__main__":
    key = jax.random.PRNGKey(0)
    k = jax.random.split(key, 9)

    # ---- Case 1: module-spec shapes (bias=True, fused small-I path). ----
    input_dim, output_dim, use_bias, batch, seq = 32, 4, True, 2, 8
    weight = init_biaffine_weight(k[0], input_dim, output_dim, use_bias)
    h = jax.random.normal(k[1], (batch, seq, input_dim), dtype=jnp.float32)
    d = jax.random.normal(k[2], (batch, seq, input_dim), dtype=jnp.float32)
    ref = _reference(h, d, weight, use_bias)

    out = jax.block_until_ready(biaffine_forward(h, d, weight, use_bias))
    assert out.shape == (batch, output_dim, seq, seq)
    assert jnp.allclose(out, ref, atol=1e-4, rtol=1e-4)

    # bf16 fast-MXU path (f32 accumulation + f32 epilogue): looser numerics.
    out_bf16 = jax.block_until_ready(
        biaffine_forward(h, d, weight, use_bias, compute_dtype=jnp.bfloat16))
    assert out_bf16.shape == (batch, output_dim, seq, seq)
    assert jnp.allclose(out_bf16, ref, atol=0.1, rtol=5e-2)

    # ---- Case 2: X and Y tiling exercised (scratch reuse across Y tiles). ----
    weight2 = init_biaffine_weight(k[3], 64, 3, True)
    h2 = jax.random.normal(k[4], (1, 16, 64), dtype=jnp.float32)
    d2 = jax.random.normal(k[5], (1, 256, 64), dtype=jnp.float32)
    ref2 = _reference(h2, d2, weight2, True)
    out2 = jax.block_until_ready(
        biaffine_forward(h2, d2, weight2, True, tile_x=8, tile_y=128))
    assert out2.shape == (1, 3, 16, 256)
    assert jnp.allclose(out2, ref2, atol=5e-4, rtol=5e-4)

    # ---- Case 3: no bias, per-o (non-fused) matmul path (I_pad >= 256). ----
    weight3 = init_biaffine_weight(k[6], 256, 2, False)
    h3 = jax.random.normal(k[7], (1, 8, 256), dtype=jnp.float32)
    d3 = jax.random.normal(k[8], (1, 8, 256), dtype=jnp.float32)
    ref3 = _reference(h3, d3, weight3, False)
    out3 = jax.block_until_ready(biaffine_forward(h3, d3, weight3, False))
    assert out3.shape == (1, 2, 8, 8)
    assert jnp.allclose(out3, ref3, atol=5e-4, rtol=5e-4)

    print("KERNEL_OK")
</pallas_src>

<mosaic_0001>
module attributes {stable_mosaic.version = 11 : i64} {
  func.func @_biaffine_kernel(%arg0: i32, %arg1: i32, %arg2: i32, %arg3: memref<1x8x32xf32, #tpu.memory_space<vmem>>, %arg4: memref<32x512xf32, #tpu.memory_space<vmem>>, %arg5: memref<1x128x8xf32, #tpu.memory_space<vmem>>, %arg6: memref<1x8x4xf32, #tpu.memory_space<vmem>>, %arg7: memref<1x4x8xf32, #tpu.memory_space<vmem>>, %arg8: memref<1x4x8x8xf32, #tpu.memory_space<vmem>>, %arg9: memref<8x512xf32, #tpu.memory_space<vmem>>) attributes {dimension_semantics = [#tpu.dimension_semantics<parallel>, #tpu.dimension_semantics<parallel>, #tpu.dimension_semantics<arbitrary>], iteration_bounds = array<i64: 2, 1, 1>, scalar_prefetch = 0 : i64, scratch_operands = 1 : i64, tpu.core_type = #tpu.core_type<tc>, window_params = [{transform_indices = @transform_0, window_bounds = array<i64: 1, 8, 32>}, {pipeline_mode = #tpu.pipeline_mode<synchronous>, transform_indices = @transform_1, window_bounds = array<i64: 32, 512>}, {transform_indices = @transform_2, window_bounds = array<i64: 1, 128, 8>}, {transform_indices = @transform_3, window_bounds = array<i64: 1, 8, 4>}, {transform_indices = @transform_4, window_bounds = array<i64: 1, 4, 8>}, {transform_indices = @transform_5, window_bounds = array<i64: 1, 4, 8, 8>}]} {
    %c0_i32 = arith.constant 0 : i32
    %0 = arith.cmpi eq, %arg2, %c0_i32 : i32
    %1 = arith.extui %0 : i1 to i32
    %c0_i32_0 = arith.constant 0 : i32
    %2 = arith.cmpi ne, %1, %c0_i32_0 : i32
    scf.if %2 {
      %c0_48 = arith.constant 0 : index
      %c0_49 = arith.constant 0 : index
      %c0_50 = arith.constant 0 : index
      %57 = vector.load %arg3[%c0_48, %c0_49, %c0_50] : memref<1x8x32xf32, #tpu.memory_space<vmem>>, vector<1x8x32xf32>
      %58 = vector.shape_cast %57 : vector<1x8x32xf32> to vector<8x32xf32>
      %c0_51 = arith.constant 0 : index
      %c0_52 = arith.constant 0 : index
      %59 = vector.load %arg4[%c0_51, %c0_52] : memref<32x512xf32, #tpu.memory_space<vmem>>, vector<32x512xf32>
      %cst_53 = arith.constant dense<0.000000e+00> : vector<8x512xf32>
      %60 = tpu.matmul %58, %59, %cst_53 {dimension_numbers = #tpu.dot_dimension_numbers<[1], [0], [0], [1], [0, 0, 1, 1], [], []>} : vector<8x32xf32>, vector<32x512xf32>, vector<8x512xf32> -> vector<8x512xf32>
      %c0_54 = arith.constant 0 : index
      %c0_55 = arith.constant 0 : index
      %61 = vector.load %arg9[%c0_54, %c0_55] : memref<8x512xf32, #tpu.memory_space<vmem>>, vector<8x512xf32>
      tpu.vector_store %arg9[%c0_54, %c0_55], %60 {strides = array<i32>} : memref<8x512xf32, #tpu.memory_space<vmem>>, vector<8x512xf32>,
    } else {
    }
    %c0 = arith.constant 0 : index
    %c0_1 = arith.constant 0 : index
    %c0_2 = arith.constant 0 : index
    %3 = vector.load %arg5[%c0, %c0_1, %c0_2] : memref<1x128x8xf32, #tpu.memory_space<vmem>>, vector<1x128x8xf32>
    %4 = vector.shape_cast %3 : vector<1x128x8xf32> to vector<128x8xf32>
    %c0_3 = arith.constant 0 : index
    %c0_4 = arith.constant 0 : index
    %5 = vector.load %arg9[%c0_3, %c0_4] : memref<8x512xf32, #tpu.memory_space<vmem>>, vector<8x128xf32>
    %cst = arith.constant dense<0.000000e+00> : vector<8x8xf32>
    %6 = tpu.matmul %5, %4, %cst {dimension_numbers = #tpu.dot_dimension_numbers<[1], [0], [0], [1], [0, 0, 1, 1], [], []>} : vector<8x128xf32>, vector<128x8xf32>, vector<8x8xf32> -> vector<8x8xf32>
    %c0_5 = arith.constant 0 : index
    %c0_6 = arith.constant 0 : index
    %c0_7 = arith.constant 0 : index
    %7 = vector.load %arg6[%c0_5, %c0_6, %c0_7] : memref<1x8x4xf32, #tpu.memory_space<vmem>>, vector<1x8x1xf32>
    %8 = vector.shape_cast %7 : vector<1x8x1xf32> to vector<8x1xf32>
    %9 = vector.broadcast %8 : vector<8x1xf32> to vector<8x8xf32>
    %10 = arith.addf %6, %9 : vector<8x8xf32>
    %c0_8 = arith.constant 0 : index
    %c0_9 = arith.constant 0 : index
    %c0_10 = arith.constant 0 : index
    %11 = vector.load %arg7[%c0_8, %c0_9, %c0_10] : memref<1x4x8xf32, #tpu.memory_space<vmem>>, vector<1x1x8xf32>
    %12 = vector.shape_cast %11 : vector<1x1x8xf32> to vector<1x8xf32>
    %13 = vector.broadcast %12 : vector<1x8xf32> to vector<8x8xf32>
    %14 = arith.addf %10, %13 : vector<8x8xf32>
    %c0_11 = arith.constant 0 : index
    %c0_12 = arith.constant 0 : index
    %c0_13 = arith.constant 0 : index
    %c0_14 = arith.constant 0 : index
    %15 = vector.load %arg8[%c0_11, %c0_12, %c0_13, %c0_14] : memref<1x4x8x8xf32, #tpu.memory_space<vmem>>, vector<1x1x8x8xf32>
    %16 = vector.shape_cast %15 : vector<1x1x8x8xf32> to vector<8x8xf32>
    %17 = vector.shape_cast %14 : vector<8x8xf32> to vector<1x1x8x8xf32>
    tpu.vector_store %arg8[%c0_11, %c0_12, %c0_13, %c0_14], %17 {strides = array<i32>} : memref<1x4x8x8xf32, #tpu.memory_space<vmem>>, vector<1x1x8x8xf32>,
    %c0_15 = arith.constant 0 : index
    %c128 = arith.constant 128 : index
    %18 = vector.load %arg9[%c0_15, %c128] : memref<8x512xf32, #tpu.memory_space<vmem>>, vector<8x128xf32>
    %cst_16 = arith.constant dense<0.000000e+00> : vector<8x8xf32>
    %19 = tpu.matmul %18, %4, %cst_16 {dimension_numbers = #tpu.dot_dimension_numbers<[1], [0], [0], [1], [0, 0, 1, 1], [], []>} : vector<8x128xf32>, vector<128x8xf32>, vector<8x8xf32> -> vector<8x8xf32>
    %c0_17 = arith.constant 0 : index
    %c0_18 = arith.constant 0 : index
    %c1 = arith.constant 1 : index
    %20 = vector.load %arg6[%c0_17, %c0_18, %c1] : memref<1x8x4xf32, #tpu.memory_space<vmem>>, vector<1x8x1xf32>
    %21 = vector.shape_cast %20 : vector<1x8x1xf32> to vector<8x1xf32>
    %22 = vector.broadcast %21 : vector<8x1xf32> to vector<8x8xf32>
    %23 = arith.addf %19, %22 : vector<8x8xf32>
    %c0_19 = arith.constant 0 : index
    %c1_20 = arith.constant 1 : index
    %c0_21 = arith.constant 0 : index
    %24 = vector.load %arg7[%c0_19, %c1_20, %c0_21] : memref<1x4x8xf32, #tpu.memory_space<vmem>>, vector<1x1x8xf32>
    %25 = vector.shape_cast %24 : vector<1x1x8xf32> to vector<1x8xf32>
    %26 = vector.broadcast %25 : vector<1x8xf32> to vector<8x8xf32>
    %27 = arith.addf %23, %26 : vector<8x8xf32>
    %c0_22 = arith.constant 0 : index
    %c1_23 = arith.constant 1 : index
    %c0_24 = arith.constant 0 : index
    %c0_25 = arith.constant 0 : index
    %28 = vector.load %arg8[%c0_22, %c1_23, %c0_24, %c0_25] : memref<1x4x8x8xf32, #tpu.memory_space<vmem>>, vector<1x1x8x8xf32>
    %29 = vector.shape_cast %28 : vector<1x1x8x8xf32> to vector<8x8xf32>
    %30 = vector.shape_cast %27 : vector<8x8xf32> to vector<1x1x8x8xf32>
    tpu.vector_store %arg8[%c0_22, %c1_23, %c0_24, %c0_25], %30 {strides = array<i32>} : memref<1x4x8x8xf32, #tpu.memory_space<vmem>>, vector<1x1x8x8xf32>,
    %c0_26 = arith.constant 0 : index
    %c256 = arith.constant 256 : index
    %31 = vector.load %arg9[%c0_26, %c256] : memref<8x512xf32, #tpu.memory_space<vmem>>, vector<8x128xf32>
    %cst_27 = arith.constant dense<0.000000e+00> : vector<8x8xf32>
    %32 = tpu.matmul %31, %4, %cst_27 {dimension_numbers = #tpu.dot_dimension_numbers<[1], [0], [0], [1], [0, 0, 1, 1], [], []>} : vector<8x128xf32>, vector<128x8xf32>, vector<8x8xf32> -> vector<8x8xf32>
    %c0_28 = arith.constant 0 : index
    %c0_29 = arith.constant 0 : index
    %c2 = arith.constant 2 : index
    %33 = vector.load %arg6[%c0_28, %c0_29, %c2] : memref<1x8x4xf32, #tpu.memory_space<vmem>>, vector<1x8x1xf32>
    %34 = vector.shape_cast %33 : vector<1x8x1xf32> to vector<8x1xf32>
    %35 = vector.broadcast %34 : vector<8x1xf32> to vector<8x8xf32>
    %36 = arith.addf %32, %35 : vector<8x8xf32>
    %c0_30 = arith.constant 0 : index
    %c2_31 = arith.constant 2 : index
    %c0_32 = arith.constant 0 : index
    %37 = vector.load %arg7[%c0_30, %c2_31, %c0_32] : memref<1x4x8xf32, #tpu.memory_space<vmem>>, vector<1x1x8xf32>
    %38 = vector.shape_cast %37 : vector<1x1x8xf32> to vector<1x8xf32>
    %39 = vector.broadcast %38 : vector<1x8xf32> to vector<8x8xf32>
    %40 = arith.addf %36, %39 : vector<8x8xf32>
    %c0_33 = arith.constant 0 : index
    %c2_34 = arith.constant 2 : index
    %c0_35 = arith.constant 0 : index
    %c0_36 = arith.constant 0 : index
    %41 = vector.load %arg8[%c0_33, %c2_34, %c0_35, %c0_36] : memref<1x4x8x8xf32, #tpu.memory_space<vmem>>, vector<1x1x8x8xf32>
    %42 = vector.shape_cast %41 : vector<1x1x8x8xf32> to vector<8x8xf32>
    %43 = vector.shape_cast %40 : vector<8x8xf32> to vector<1x1x8x8xf32>
    tpu.vector_store %arg8[%c0_33, %c2_34, %c0_35, %c0_36], %43 {strides = array<i32>} : memref<1x4x8x8xf32, #tpu.memory_space<vmem>>, vector<1x1x8x8xf32>,
    %c0_37 = arith.constant 0 : index
    %c384 = arith.constant 384 : index
    %44 = vector.load %arg9[%c0_37, %c384] : memref<8x512xf32, #tpu.memory_space<vmem>>, vector<8x128xf32>
    %cst_38 = arith.constant dense<0.000000e+00> : vector<8x8xf32>
    %45 = tpu.matmul %44, %4, %cst_38 {dimension_numbers = #tpu.dot_dimension_numbers<[1], [0], [0], [1], [0, 0, 1, 1], [], []>} : vector<8x128xf32>, vector<128x8xf32>, vector<8x8xf32> -> vector<8x8xf32>
    %c0_39 = arith.constant 0 : index
    %c0_40 = arith.constant 0 : index
    %c3 = arith.constant 3 : index
    %46 = vector.load %arg6[%c0_39, %c0_40, %c3] : memref<1x8x4xf32, #tpu.memory_space<vmem>>, vector<1x8x1xf32>
    %47 = vector.shape_cast %46 : vector<1x8x1xf32> to vector<8x1xf32>
    %48 = vector.broadcast %47 : vector<8x1xf32> to vector<8x8xf32>
    %49 = arith.addf %45, %48 : vector<8x8xf32>
    %c0_41 = arith.constant 0 : index
    %c3_42 = arith.constant 3 : index
    %c0_43 = arith.constant 0 : index
    %50 = vector.load %arg7[%c0_41, %c3_42, %c0_43] : memref<1x4x8xf32, #tpu.memory_space<vmem>>, vector<1x1x8xf32>
    %51 = vector.shape_cast %50 : vector<1x1x8xf32> to vector<1x8xf32>
    %52 = vector.broadcast %51 : vector<1x8xf32> to vector<8x8xf32>
    %53 = arith.addf %49, %52 : vector<8x8xf32>
    %c0_44 = arith.constant 0 : index
    %c3_45 = arith.constant 3 : index
    %c0_46 = arith.constant 0 : index
    %c0_47 = arith.constant 0 : index
    %54 = vector.load %arg8[%c0_44, %c3_45, %c0_46, %c0_47] : memref<1x4x8x8xf32, #tpu.memory_space<vmem>>, vector<1x1x8x8xf32>
    %55 = vector.shape_cast %54 : vector<1x1x8x8xf32> to vector<8x8xf32>
    %56 = vector.shape_cast %53 : vector<8x8xf32> to vector<1x1x8x8xf32>
    tpu.vector_store %arg8[%c0_44, %c3_45, %c0_46, %c0_47], %56 {strides = array<i32>} : memref<1x4x8x8xf32, #tpu.memory_space<vmem>>, vector<1x1x8x8xf32>,
    return
  }
  func.func @transform_0(%arg0: i32, %arg1: i32, %arg2: i32) -> (i32, i32, i32) {
    %c0_i32 = arith.constant 0 : i32
    %c0_i32_0 = arith.constant 0 : i32
    return %arg0, %arg1, %c0_i32 : i32, i32, i32
  }
  func.func @transform_1(%arg0: i32, %arg1: i32, %arg2: i32) -> (i32, i32) {
    %c0_i32 = arith.constant 0 : i32
    %c0_i32_0 = arith.constant 0 : i32
    %c0_i32_1 = arith.constant 0 : i32
    return %c0_i32, %c0_i32_0 : i32, i32
  }
  func.func @transform_2(%arg0: i32, %arg1: i32, %arg2: i32) -> (i32, i32, i32) {
    %c0_i32 = arith.constant 0 : i32
    %c0_i32_0 = arith.constant 0 : i32
    return %arg0, %c0_i32, %arg2 : i32, i32, i32
  }
  func.func @transform_3(%arg0: i32, %arg1: i32, %arg2: i32) -> (i32, i32, i32) {
    %c0_i32 = arith.constant 0 : i32
    %c0_i32_0 = arith.constant 0 : i32
    return %arg0, %arg1, %c0_i32 : i32, i32, i32
  }
  func.func @transform_4(%arg0: i32, %arg1: i32, %arg2: i32) -> (i32, i32, i32) {
    %c0_i32 = arith.constant 0 : i32
    %c0_i32_0 = arith.constant 0 : i32
    return %arg0, %c0_i32, %arg2 : i32, i32, i32
  }
  func.func @transform_5(%arg0: i32, %arg1: i32, %arg2: i32) -> (i32, i32, i32, i32) {
    %c0_i32 = arith.constant 0 : i32
    %c0_i32_0 = arith.constant 0 : i32
    return %arg0, %c0_i32, %arg1, %arg2 : i32, i32, i32, i32
  }
}

</mosaic_0001>

<bundles_post_ra>
// kernel: tpu_custom_call.1
= control target key start
LH: loop header
LB: loop body
LE: loop exit
PB: predicated region body
PF: predicated region fallthrough
CT: control target
= control target key end

     0   :  { %10 = vsyncpa [#allocation4], 0  ;;  %s1838_s0 = inlined_call_operand.vmem [shape: f32[2,8,32], index: 0, kind: input, shape index: {}]   ;;  %s1839_s1 = inlined_call_operand.vmem [shape: f32[32,512], index: 1, kind: input, shape index: {}]   ;;  %s1840_s2 = inlined_call_operand.vmem [shape: f32[2,128,8], index: 2, kind: input, shape index: {}]   ;;  %s1841_s3 = inlined_call_operand.vmem [shape: f32[2,8,4], index: 3, kind: input, shape index: {}]   ;;  %s1842_s4 = inlined_call_operand.vmem [shape: f32[2,4,8], index: 4, kind: input, shape index: {}]   ;;  %s1843_s5 = inlined_call_operand.hbm [shape: f32[2,4,8,8], index: 5, kind: output, shape index: {}]  }
   0x1   :  { %12 = vsyncpa [#allocation4 + $0x1], 0  ;;  %s1547_s18 = smov 0   ;;  %s1549_s19 = smov 0  }
   0x2   :  { %s1551_s20 = smov 0   ;;  %s1553_s21 = smov 0  }
   0x3   :  { %s1555_s22 = smov 0   ;;  %s1557_s23 = smov 0  }
   0x4 LB: > { %s1011_s24 = sadd.s32 4294967295, %s1505_s23   ;;  %s1012_s25 = sadd.s32 4294967294, %s1505_s23   ;;  %s1505_s23 = sphi %s1557_s23, %s18_s23   ;;  %s1501_s22 = sphi %s1555_s22, %s1850_s22   ;;  %s1497_s21 = sphi %s1553_s21, %s1849_s21   ;;  %s1493_s20 = sphi %s1551_s20, %s1848_s20   ;;  %s1489_s19 = sphi %s1549_s19, %s1847_s19   ;;  %s1485_s18 = sphi %s1547_s18, %s1846_s18  }
   0x5   : > { %s37_s26 = sadd.s32 1, %s1501_s22  ;;  %s181_s27 = sadd.s32 1, %s1493_s20 }
   0x6   : > { %p39_p0 = scmp.ge.s32.totalorder %s37_s26, 2  ;;  %p191_p1 = scmp.ne.s32.totalorder %s1493_s20, %s1489_s19 }
   0x7   : > { %p192_p2 = scmp.eq.s32.totalorder %s1011_s24, 1  ;;  %p197_p3 = scmp.ne.s32.totalorder %s1489_s19, %s1485_s18 }
   0x8   : > { %s1852_s26 = smov (%p39_p0, %s37_s26), 0  ;;  %p198_p5 = scmp.eq.s32.totalorder %s1012_s25, 1 }
   0x9   : > { %p1587_p4 = por %p192_p2, %p191_p1  ;;  %s174_s29 = ssub.s32 %s1501_s22, %s1852_s26 }
   0xa   : > { %p1015_p6 = scmp.ge.s32.totalorder %s1505_s23, 1  ;;  %p179_p7 = scmp.eq.s32.totalorder %s174_s29, 0 }
   0xb   : > { %p1594_p8 = por %p198_p5, %p197_p3  ;;  %p260_p9 = scmp.lt.s32.totalorder %s1505_s23, 3 }
   0xc   : > { %s1600_s6 = scalar_select %p179_p7, %s1493_s20, %s181_s27  }
   0xd   : > { %p261_p10 = pnand %p1015_p6, %p260_p9 }
   0xe   : > { %v347_v0 = vld [vmem:[%s1839_s1 + $0x8] sm:$0xff] (!%p261_p10)  ;;  %v346_v2 = vld [vmem:[%s1839_s1] sm:$0xff] (!%p261_p10)  ;;  %p312_p11 = scmp.lt.s32.totalorder (!%p261_p10), %s1497_s21, 1  ;;  %v1507_v7 = vmov (!%p261_p10), 0.0   ;;  %v349_v12 = vld [vmem:[%s1839_s1 + $0x18] sm:$0xff] (!%p261_p10)  ;;  %vm362_vm0 = vcmask (!%p261_p10), 261120  }
   0xf   : > { %264 = sbr.rel (%p261_p10) target bundleno = 504 (0x1f8), region = 40  ;;  %v351_v1 = vld [vmem:[%s1839_s1 + $0x28] sm:$0xff] (!%p261_p10)  ;;  %v350_v4 = vld [vmem:[%s1839_s1 + $0x20] sm:$0xff] (!%p261_p10)  ;;  %430 = vmatprep.mubr.f32.mxu0 (!%p261_p10), %v1507_v7  ;;  %501 = vmatprep.mubr.f32.mxu1 (!%p261_p10), %v1507_v7  ;;  %v353_v13 = vld [vmem:[%s1839_s1 + $0x38] sm:$0xff] (!%p261_p10)  ;;  %v1508_v29 = vmov (!%p261_p10), 0.0|0.0   ;;  %vm1509_vm1 = vmmov (!%p261_p10), 0  }
  0x10   : > { %v1246_v3 = vpack.c.bf16 (!%p261_p10), %v351_v1, %v347_v0  ;;  %v355_v5 = vld [vmem:[%s1839_s1 + $0x48] sm:$0xff] (!%p261_p10)  ;;  %v1248_v8 = vpack.c.bf16 (!%p261_p10), %v350_v4, %v346_v2  ;;  %v354_v10 = vld [vmem:[%s1839_s1 + $0x40] sm:$0xff] (!%p261_p10)  ;;  %v348_v14 = vld [vmem:[%s1839_s1 + $0x10] sm:$0xff] (!%p261_p10)  ;;  %v1254_v17 = vpack.c.bf16 (!%p261_p10), %v353_v13, %v349_v12  ;;  %v1510_v51 = vmov (!%p261_p10), 0   ;;  %s309_s9 = sand.u32 (!%p261_p10), 1, %s1489_s19   ;;  %s1037_s15 = sshll.u32 (!%p261_p10), %s1497_s21, 9 }
  0x11   : > { %v359_v6 = vld [vmem:[%s1839_s1 + $0x68] sm:$0xff] (!%p261_p10)  ;;  %v358_v11 = vld [vmem:[%s1839_s1 + $0x60] sm:$0xff] (!%p261_p10)  ;;  %v352_v15 = vld [vmem:[%s1839_s1 + $0x30] sm:$0xff] (!%p261_p10)  ;;  %1422 = vset.pattern.permute.xlu0 (!%p261_p10), %v1510_v51  ;;  %v1511_v53 = vmov (!%p261_p10), 2   ;;  %v1512_v54 = vmov (!%p261_p10), 1   ;;  %v1513_v55 = vmov (!%p261_p10), 3   ;;  %s1784_s27 = scalar_lea.hbm (!%p261_p10), %s1843_s5, %s1037_s15 }
  0x12   : > { %v1250_v9 = vpack.c.bf16 (!%p261_p10), %v359_v6, %v355_v5  ;;  %1247 = vmatprep.subr.bf16.mxu0 (!%p261_p10), %v1246_v3  ;;  %v1252_v16 = vpack.c.bf16 (!%p261_p10), %v358_v11, %v354_v10  ;;  %v1256_v18 = vpack.c.bf16 (!%p261_p10), %v352_v15, %v348_v14  ;;  %v357_v19 = vld [vmem:[%s1839_s1 + $0x58] sm:$0xff] (!%p261_p10)  ;;  %v356_v21 = vld [vmem:[%s1839_s1 + $0x50] sm:$0xff] (!%p261_p10)  ;;  %1255 = vmatprep.subr.bf16.mxu1 (!%p261_p10), %v1254_v17  ;;  %vm611_vm2 = vcmask (!%p261_p10), 64512   ;;  %s1514_s29 = smov (!%p261_p10), [#allocation3]  }
  0x13   : > { %1249 = vmatpush1.bf16.msra.mxu0 (!%p261_p10), %v1248_v8  ;;  %v361_v20 = vld [vmem:[%s1839_s1 + $0x78] sm:$0xff] (!%p261_p10)  ;;  %v360_v23 = vld [vmem:[%s1839_s1 + $0x70] sm:$0xff] (!%p261_p10)  ;;  %1424 = vset.pattern.permute.xlu1 (!%p261_p10), %v1511_v53 }
  0x14   : > { %1251 = vmatprep.subr.bf16.mxu0 (!%p261_p10), %v1250_v9  ;;  %v1258_v22 = vpack.c.bf16 (!%p261_p10), %v361_v20, %v357_v19  ;;  %1257 = vmatpush1.bf16.msra.mxu1 (!%p261_p10), %v1256_v18  ;;  %v1260_v26 = vpack.c.bf16 (!%p261_p10), %v360_v23, %v356_v21 }
  0x16   : > { %s1630_s8 = scalar_select %p312_p11, %s1497_s21, 1  ;;  %1259 = vmatprep.subr.bf16.mxu1 %v1258_v22 }
  0x17   : > { %1253 = vmatpush1.bf16.msra.mxu0 %v1252_v16  ;;  %s1792_s21 = scalar_lea.sflag [#allocation4], %s309_s9 }
  0x18   : > { %s1017_s17 = sshll.u32 %s1630_s8, 3  ;;  %s1036_s24 = sshll.u32 %s1630_s8, 7  ;;  %1262 = vmatprep.subr.bf16.mxu0 %v1508_v29  ;;  %1261 = vmatpush1.bf16.msra.mxu1 %v1260_v26 }
  0x19   : > { %s318_s13 = scalar_lea.vmem %s1838_s0, %s1017_s17  ;;  %s1663_s16 = scalar_lea.vmem %s1840_s2, %s1036_s24  ;;  %1286 = vmatprep.subr.bf16.mxu1 %v1508_v29 }
  0x1a   : > { %v512_v24 = vld [vmem:[%s1663_s16] sm:$0xff]  ;;  %v513_v25 = vld [vmem:[%s1663_s16 + $0x8] sm:$0xff]  ;;  %v514_v30 = vld [vmem:[%s1663_s16 + $0x10] sm:$0xff]  ;;  %s333_s7 = scalar_lea.vmem %s1841_s3, %s1017_s17  ;;  %s1021_s17 = sshll.u32 %s1630_s8, 2 }
  0x1b   : > { %v345_v27 = vld [vmem:[%s318_s13] sm:$0xff]  ;;  %v1670_v28 = vpack.c.bf16 %v513_v25, %v512_v24  ;;  %v515_v31 = vld [vmem:[%s1663_s16 + $0x18] sm:$0xff]  ;;  %v517_v34 = vld [vmem:[%s1663_s16 + $0x28] sm:$0xff]  ;;  %s340_s12 = scalar_lea.vmem %s1842_s4, %s1021_s17  ;;  %s1016_s13 = sshll.u32 %s309_s9, 5 }
  0x1c   : > { %1022 = vmatmul.mubr.msk.f32.vlgmr.msra.gmra.mrb[0].mxu0 %vm362_vm0, %v345_v27  ;;  %v1677_v32 = vpack.c.bf16 %v515_v31, %v514_v30  ;;  %v516_v33 = vld [vmem:[%s1663_s16 + $0x20] sm:$0xff]  ;;  %1023 = vmatmul.mubr.msk.f32.vlgmr.msra.gmra.mrb[0].mxu1 %vm362_vm0, %v345_v27  ;;  %v518_v36 = vld [vmem:[%s1663_s16 + $0x30] sm:$0xff]  ;;  %v519_v37 = vld [vmem:[%s1663_s16 + $0x38] sm:$0xff]  ;;  %s311_s8 = scalar_lea.vmem [#allocation3], %s1016_s13 }
  0x1d   : > { %1264 = vmatpush3.bf16.msra.mxu0 %v1670_v28  ;;  %1288 = vmatpush3.bf16.msra.mxu1 %v1670_v28  ;;  %v1685_v35 = vpack.c.bf16 %v517_v34, %v516_v33  ;;  %v1693_v38 = vpack.c.bf16 %v519_v37, %v518_v36  ;;  %v520_v39 = vld [vmem:[%s1663_s16 + $0x40] sm:$0xff]  ;;  %v521_v40 = vld [vmem:[%s1663_s16 + $0x48] sm:$0xff]  ;;  %v522_v42 = vld [vmem:[%s1663_s16 + $0x50] sm:$0xff]  ;;  %s884_s14 = sshll.u32 %s311_s8, 4  ;;  %s1786_s14 = int_to_ptr.vmem [resolvable:$true] %s884_s14 }
  0x1e   : > { %1265 = vmatprep.subr.bf16.mxu0 %v1508_v29  ;;  %1289 = vmatprep.subr.bf16.mxu1 %v1508_v29  ;;  %v1701_v41 = vpack.c.bf16 %v521_v40, %v520_v39  ;;  %v523_v43 = vld [vmem:[%s1663_s16 + $0x58] sm:$0xff]  ;;  %v524_v45 = vld [vmem:[%s1663_s16 + $0x60] sm:$0xff]  ;;  %v525_v46 = vld [vmem:[%s1663_s16 + $0x68] sm:$0xff]  ;;  %s1427_s24 = scalar_lea.vmem %s1786_s14, 512 }
  0x1f   : > { %v1709_v44 = vpack.c.bf16 %v523_v43, %v522_v42  ;;  %v1717_v47 = vpack.c.bf16 %v525_v46, %v524_v45  ;;  %v526_v48 = vld [vmem:[%s1663_s16 + $0x70] sm:$0xff]  ;;  %v527_v49 = vld [vmem:[%s1663_s16 + $0x78] sm:$0xff]  ;;  %1138 = vmatprep.mubr.msk.f32.mxu0 %vm1509_vm1, %v1507_v7  ;;  %1173 = vmatprep.mubr.msk.f32.mxu1 %vm1509_vm1, %v1507_v7  ;;  %v529_v52 = vld [vmem:[%s333_s7] sm:$0xff]  ;;  %p1428_p12 = scmp.ne.s32.totalorder %s1786_s14, %s1427_s24  ;;  %s1431_s7 = sshll.u32 %s1514_s29, 4  ;;  %s1432_s7 = int_to_ptr.vmem [resolvable:$false] %s1431_s7 }
  0x20   : > { %v1284_v50 = vpack.c.bf16 %v527_v49, %v526_v48  ;;  %532 = vperm.xlu0 %1422, %v529_v52   ;;  %702 = vperm.xlu1 %1424, %v529_v52   ;;  %v1024_v63 = vld [vmem:[%s340_s12] ss:$0 sm:$0xff]  ;;  %v1025_v3 = vld [vmem:[%s340_s12 + $0x1] ss:$0 sm:$0xff]  ;;  %v1027_v11 = vld [vmem:[%s340_s12 + $0x2] ss:$0 sm:$0xff]  ;;  %p1434_p1 = scmp.lt.s32.totalorder %s1786_s14, %s1432_s7 }
  0x21   : > { %1267 = vmatpush3.bf16.msra.mxu0 %v1677_v32  ;;  %1291 = vmatpush3.bf16.msra.mxu1 %v1677_v32  ;;  %v1029_v15 = vld [vmem:[%s340_s12 + $0x3] ss:$0 sm:$0xff]  ;;  %p1429_p13 = pnand %p1428_p12, %p1587_p4  ;;  %s1433_s17 = scalar_lea.vmem %s1432_s7, 1024 }
  0x22   : > { %1268 = vmatprep.subr.bf16.mxu0 %v1508_v29  ;;  %1292 = vmatprep.subr.bf16.mxu1 %v1508_v29  ;;  %p1435_p2 = scmp.lt.s32.totalorder %s1433_s17, %s1427_s24 }
  0x23   : > { %p1430_p0 = pneg %p1429_p13 }
  0x24   : > { %1423 = vset.pattern.permute.xlu0 %v1512_v54  ;;  %1425 = vset.pattern.permute.xlu1 %v1513_v55  ;;  %p1436_p3 = por %p1435_p2, %p1434_p1 }
  0x25   : > { %1270 = vmatpush3.bf16.msra.mxu0 %v1685_v35  ;;  %1294 = vmatpush3.bf16.msra.mxu1 %v1685_v35 }
  0x26   : > { %1271 = vmatprep.subr.bf16.mxu0 %v1508_v29  ;;  %1295 = vmatprep.subr.bf16.mxu1 %v1508_v29  ;;  %p1437_p5 = pnand %p1436_p3, %p1430_p0 }
  0x27   : > { %617 = vperm.xlu0 %1423, %v529_v52   ;;  %787 = vperm.xlu1 %1425, %v529_v52  }
  0x29   : > { %1273 = vmatpush3.bf16.msra.mxu0 %v1693_v38  ;;  %1297 = vmatpush3.bf16.msra.mxu1 %v1693_v38 }
  0x2a   : > { %1274 = vmatprep.subr.bf16.mxu0 %v1508_v29  ;;  %1298 = vmatprep.subr.bf16.mxu1 %v1508_v29 }
  0x2b   : > { %1426 = vset.pattern.permute.xlu0 %v1513_v55 }
  0x2d   : > { %1276 = vmatpush3.bf16.msra.mxu0 %v1701_v41  ;;  %1300 = vmatpush3.bf16.msra.mxu1 %v1701_v41 }
  0x2e   : > { %1277 = vmatprep.subr.bf16.mxu0 %v1508_v29  ;;  %1301 = vmatprep.subr.bf16.mxu1 %v1508_v29 }
  0x31   : > { %1279 = vmatpush3.bf16.msra.mxu0 %v1709_v44  ;;  %1303 = vmatpush3.bf16.msra.mxu1 %v1709_v44 }
  0x32   : > { %1280 = vmatprep.subr.bf16.mxu0 %v1508_v29  ;;  %1304 = vmatprep.subr.bf16.mxu1 %v1508_v29 }
  0x35   : > { %1282 = vmatpush3.bf16.msra.mxu0 %v1717_v47  ;;  %1306 = vmatpush3.bf16.msra.mxu1 %v1717_v47 }
  0x36   : > { %1283 = vmatprep.subr.bf16.mxu0 %v1508_v29  ;;  %1307 = vmatprep.subr.bf16.mxu1 %v1508_v29 }
  0x39   : > { %1285 = vmatpush3.bf16.msra.mxu0 %v1284_v50  ;;  %1309 = vmatpush3.bf16.msra.mxu1 %v1284_v50 }
  0x3a   : > { %1310 = vmatprep.subr.bf16.mxu0 %v1508_v29  ;;  %1334 = vmatprep.subr.bf16.mxu1 %v1508_v29 }
  0x9f   : > { %v533_v60 = vpop.permute.xlu0 %532  ;;  %v703_v8 = vpop.permute.xlu1 %702 }
  0xa6   : > { %v618_v61 = vpop.permute.xlu0 %617  ;;  %v788_v9 = vpop.permute.xlu1 %787 }
  0xef   : > { %v432_v56 = vpop.f32.mrb[0].mxu0  ;;  %v503_v58 = vpop.f32.mrb[0].mxu1 }
  0xf0   : > { %v434_v57 = vpop.f32.mrb[1].mxu0  ;;  %1139 = vmatmul.mubr.f32.vlgmr.msra.gmra.mrb[2].mxu0 %v432_v56  ;;  %v505_v59 = vpop.f32.mrb[1].mxu1 }
  0xf1   : > { %1312 = vmatpush3.bf16.msra.mxu0 %v1670_v28  ;;  %1174 = vmatmul.mubr.f32.vlgmr.msra.gmra.mrb[2].mxu1 %v434_v57 }
  0xf2   : > { %1336 = vmatpush3.bf16.msra.mxu1 %v1670_v28  ;;  %1313 = vmatprep.subr.bf16.mxu0 %v1508_v29 }
  0xf3   : > { %1337 = vmatprep.subr.bf16.mxu1 %v1508_v29  ;;  %1208 = vmatprep.mubr.msk.f32.mxu0 %vm1509_vm1, %v1507_v7 }
  0xf4   : > { %1243 = vmatprep.mubr.msk.f32.mxu1 %vm1509_vm1, %v1507_v7 }
  0xf5   : > { %1315 = vmatpush3.bf16.msra.mxu0 %v1677_v32 }
  0xf6   : > { %1339 = vmatpush3.bf16.msra.mxu1 %v1677_v32  ;;  %1316 = vmatprep.subr.bf16.mxu0 %v1508_v29 }
  0xf7   : > { %1340 = vmatprep.subr.bf16.mxu1 %v1508_v29 }
  0xf9   : > { %1318 = vmatpush3.bf16.msra.mxu0 %v1685_v35 }
  0xfa   : > { %1342 = vmatpush3.bf16.msra.mxu1 %v1685_v35  ;;  %1319 = vmatprep.subr.bf16.mxu0 %v1508_v29 }
  0xfb   : > { %1343 = vmatprep.subr.bf16.mxu1 %v1508_v29 }
  0xfd   : > { %1321 = vmatpush3.bf16.msra.mxu0 %v1693_v38 }
  0xfe   : > { %1345 = vmatpush3.bf16.msra.mxu1 %v1693_v38  ;;  %1322 = vmatprep.subr.bf16.mxu0 %v1508_v29 }
  0xff   : > { %1346 = vmatprep.subr.bf16.mxu1 %v1508_v29 }
 0x101   : > { %1324 = vmatpush3.bf16.msra.mxu0 %v1701_v41 }
 0x102   : > { %1348 = vmatpush3.bf16.msra.mxu1 %v1701_v41  ;;  %1325 = vmatprep.subr.bf16.mxu0 %v1508_v29 }
 0x103   : > { %1349 = vmatprep.subr.bf16.mxu1 %v1508_v29 }
 0x105   : > { %1327 = vmatpush3.bf16.msra.mxu0 %v1709_v44 }
 0x106   : > { %1351 = vmatpush3.bf16.msra.mxu1 %v1709_v44  ;;  %1328 = vmatprep.subr.bf16.mxu0 %v1508_v29 }
 0x107   : > { %1352 = vmatprep.subr.bf16.mxu1 %v1508_v29 }
 0x109   : > { %1330 = vmatpush3.bf16.msra.mxu0 %v1717_v47 }
 0x10a   : > { %1354 = vmatpush3.bf16.msra.mxu1 %v1717_v47  ;;  %1331 = vmatprep.subr.bf16.mxu0 %v1508_v29 }
 0x10b   : > { %1355 = vmatprep.subr.bf16.mxu1 %v1508_v29 }
 0x10d   : > { %1333 = vmatpush3.bf16.msra.mxu0 %v1284_v50 }
 0x10e   : > { %1357 = vmatpush3.bf16.msra.mxu1 %v1284_v50 }
 0x110   : > { %1209 = vmatmul.mubr.f32.vlgmr.msra.gmra.mrb[4].mxu0 %v503_v58 }
 0x111   : > { %1244 = vmatmul.mubr.f32.vlgmr.msra.gmra.mrb[4].mxu1 %v505_v59 }
 0x1c3   : > { %v601_v62 = vpop.f32.mrb[2].mxu0 }
 0x1c4   : > { %v602_v0 = vadd.f32 %v601_v62, %v533_v60  ;;  %v1140_v1 = vpop.f32.mrb[3].mxu0  ;;  %v686_v2 = vpop.f32.mrb[2].mxu1 }
 0x1c5   : > { %v687_v4 = vadd.f32 %v686_v2, %v618_v61  ;;  %v1175_v5 = vpop.f32.mrb[3].mxu1 }
 0x1c6   : > { %v610_v6 = vadd.f32 %v1024_v63, %v602_v0 }
 0x1c7   : > { %v695_v7 = vadd.f32 %v1025_v3, %v687_v4 }
 0x1c8   : > { %612 = vst.msk [vmem:[%s311_s8] sm:$0xff] %vm611_vm2, %v610_v6 }
 0x1c9   : > { %1026 = vst.msk [vmem:[%s311_s8 + $0x8] sm:$0xff] %vm611_vm2, %v695_v7 }
 0x1e3   : > { %v771_v10 = vpop.f32.mrb[4].mxu0 }
 0x1e4   : > { %v772_v12 = vadd.f32 %v771_v10, %v703_v8  ;;  %v1210_v13 = vpop.f32.mrb[5].mxu0  ;;  %v856_v14 = vpop.f32.mrb[4].mxu1 }
 0x1e5   : > { %v857_v16 = vadd.f32 %v856_v14, %v788_v9  ;;  %v1245_v17 = vpop.f32.mrb[5].mxu1 }
 0x1e6   : > { %v780_v18 = vadd.f32 %v1027_v11, %v772_v12 }
 0x1e7   : > { %v865_v19 = vadd.f32 %v1029_v15, %v857_v16 }
 0x1e8   : > { %1028 = vst.msk [vmem:[%s311_s8 + $0x10] sm:$0xff] %vm611_vm2, %v780_v18 }
 0x1e9   : > { %1030 = vst.msk [vmem:[%s311_s8 + $0x18] sm:$0xff] %vm611_vm2, %v865_v19 }
 0x1ea   : > { %1440 = shalt.err (!%p1437_p5)
}
 0x1eb   : > { %s1441_s9 = scalar_lea.hbm %s1784_s27, 512  ;;  %s1445_s12 = scalar_lea.hbm %s1843_s5, 1024 }
 0x1ec   : > { %p1442_p6 = scmp.ne.s32.totalorder %s1784_s27, %s1441_s9  ;;  %p1446_p10 = scmp.lt.u32.totalorder %s1784_s27, %s1843_s5 }
 0x1ed   : > { %p1447_p11 = scmp.lt.u32.totalorder %s1445_s12, %s1441_s9  ;;  %p1449_p13 = scmp.lt.u32.totalorder %s1441_s9, %s1784_s27 }
 0x1ee   : > { %p1443_p7 = pnand %p1442_p6, %p1587_p4 }
 0x1ef   : > { %p1448_p12 = por %p1447_p11, %p1446_p10 }
 0x1f0   : > { %p1444_p9 = pneg %p1443_p7 }
 0x1f1   : > { %p1450_p0 = por %p1449_p13, %p1448_p12 }
 0x1f3   : > { %p1451_p1 = pnand %p1450_p0, %p1444_p9 }
 0x1f5   : > { %1454 = shalt.err (!%p1451_p1)
}
 0x1f6   : > { %s1515_s15 = smov 128   ;;  %s1516_s16 = smov 8  }
 0x1f7   : > { %1358 = dma.vmem_to_hbm [thread:$0]  (%p1587_p4), %s1786_s14, 512, %s1784_s27, %s1792_s21, %s1515_s15, %s1515_s15, %s1516_s16  }
 0x1f8 PF: > { %p1364_p2 = scmp.ge.s32.totalorder %s1505_s23, 2  ;;  %s899_s25 = sand.u32 1, %s1485_s18  }
 0x1f9   : > { %s900_s24 = scalar_lea.sflag [#allocation4], %s899_s25 }
 0x1fa   : > { %p1361_p3 = pnand %p1364_p2, %p1594_p8 }
 0x1fc   : > { %1480 = dma.done.wait (!%p1361_p3), %s900_s24, 512  }
 0x1fd   : > { %1482 = vsyncadd (!%p1361_p3), %s900_s24, 4294966784  ;;  %s18_s23 = sadd.s32 1, %s1505_s23   ;;  %s1846_s18 = smov %s1489_s19 }
 0x1fe   : > { %p15_p5 = scmp.ge.s32.totalorder %s18_s23, 4   ;;  %s1847_s19 = smov %s1493_s20 }
 0x1ff   : > { %s1848_s20 = smov %s1600_s6  ;;  %s1849_s21 = smov %s1501_s22 }
 0x200   : > { %s1850_s22 = smov %s1852_s26  ;;  %17 = sbr.rel (!%p15_p5) target bundleno = 4 (0x4), region = 91 }
 0x207   :  { %905 = vsyncpa [#allocation4], 1 }
 0x208   :  { %907 = vsyncpa [#allocation4 + $0x1], 1 }

</bundles_post_ra>
